<compile_context>
chip_gen: v7x
topology: tpu7x:2x2x1
jax: 0.10.0
libtpu: 0.0.40
codegen_flags: <defaults>
</compile_context>

<pallas_src>
import jax
import jax.numpy as jnp
from jax import lax
from jax.experimental import pallas as pl
from jax.experimental.pallas import tpu as pltpu

_LANE = 128
_SUBLANE = 8
# Scoped-VMEM limit requested from Mosaic: >= every chip's default scoped
# limit (v5e 16 MiB), <= every chip's physical VMEM (v7x 64 MiB per TC).
_VMEM_LIMIT_BYTES = 32 * 1024 * 1024
# Footprint budget used to size tile_b (headroom under the limit above).
_FOOTPRINT_BUDGET = 24 * 1024 * 1024


def _linear_kernel(x_ref, w_ref, b_ref, o_ref):
    """One batch tile of y = x @ W.T + b.

    x_ref: [tile_b, d_model]   (compute dtype, e.g. bf16)
    w_ref: [n_pad, d_model]    (PyTorch layout; MXU handles trans_b natively)
    b_ref: [1, n_pad]          (f32, lane-aligned 2-D)
    o_ref: [tile_b, n_pad]     (n_pad multiple of 128 -> unmasked `vst` stores)
    """
    acc = lax.dot_general(
        x_ref[...], w_ref[...],
        dimension_numbers=(((1,), (1,)), ((), ())),   # contract over d_model
        preferred_element_type=jnp.float32,
    )
    o_ref[...] = (acc + b_ref[...]).astype(o_ref.dtype)


def prepare_head_params(weight, bias, compute_dtype=jnp.bfloat16):
    """Pad num_classes to a multiple of 128 lanes and cast the weight.

    In production call this ONCE at init and reuse the result, so the per-call
    wrapper does no weight-side HBM work at all.
    """
    num_classes, _ = weight.shape
    n_pad = ((num_classes + _LANE - 1) // _LANE) * _LANE
    w = weight.astype(compute_dtype) if compute_dtype is not None else weight
    b = bias
    if n_pad != num_classes:
        w = jnp.pad(w, ((0, n_pad - num_classes), (0, 0)))
        b = jnp.pad(b, (0, n_pad - num_classes))
    # Bias is added in f32 after the f32 MXU accumulate; keep it 2-D, lane axis last.
    b2d = b.reshape(1, n_pad).astype(jnp.float32)
    return w, b2d, num_classes


def _round_up(v, m):
    return ((v + m - 1) // m) * m


def _pick_tile_b(B, d_model, n_pad, x_itemsize, w_itemsize, out_itemsize):
    """Largest batch tile whose VMEM footprint fits the budget."""
    # Resident weight + bias (constant index_map -> single copy kept in VMEM).
    fixed = n_pad * d_model * w_itemsize + n_pad * 4
    # Double-buffered activations and output tiles.
    per_row = 2 * d_model * x_itemsize + 2 * n_pad * out_itemsize
    t = (_FOOTPRINT_BUDGET - fixed) // max(per_row, 1)
    t = max(_SUBLANE, (t // _SUBLANE) * _SUBLANE)
    t = min(t, 2048)            # diminishing returns past ~2k rows
    if B <= t:
        if B > _SUBLANE:
            # >=2 grid steps so v7x's two TensorCores both get a share.
            half = _round_up(-(-B // 2), _SUBLANE)
            return min(half, t)
        return B                # tiny batch: one full-array block
    return t


def mamba_classification_head(hidden_states, weight, bias, *,
                              tile_b=None, compute_dtype=jnp.bfloat16):
    """Pallas forward pass of MambaClassificationHead.

    hidden_states: [..., d_model]
    weight:        [num_classes, d_model]   (PyTorch nn.Linear layout)
    bias:          [num_classes]
    returns:       [..., num_classes] in hidden_states.dtype

    compute_dtype=None keeps the full f32 stream (exact nn.Linear numerics);
    the default bf16 stream halves HBM traffic of this memory-bound op while
    accumulating in f32 on the MXU.
    """
    orig_shape = hidden_states.shape
    d_model = orig_shape[-1]
    x = hidden_states.reshape(-1, d_model)
    B = x.shape[0]
    out_dtype = hidden_states.dtype

    w, b2d, num_classes = prepare_head_params(weight, bias, compute_dtype)
    n_pad = w.shape[0]
    if compute_dtype is not None:
        x = x.astype(compute_dtype)

    if tile_b is None:
        tile_b = _pick_tile_b(
            B, d_model, n_pad,
            jnp.dtype(x.dtype).itemsize,
            jnp.dtype(w.dtype).itemsize,
            jnp.dtype(out_dtype).itemsize,
        )
    tile_b = max(1, min(tile_b, B))

    grid = (pl.cdiv(B, tile_b),)   # partial final tile handled by Pallas

    out = pl.pallas_call(
        _linear_kernel,
        out_shape=jax.ShapeDtypeStruct((B, n_pad), out_dtype),
        grid_spec=pltpu.PrefetchScalarGridSpec(
            num_scalar_prefetch=0,
            grid=grid,
            in_specs=[
                pl.BlockSpec((tile_b, d_model), lambda i: (i, 0)),   # activations
                pl.BlockSpec((n_pad, d_model), lambda i: (0, 0)),    # weight (resident)
                pl.BlockSpec((1, n_pad), lambda i: (0, 0)),          # bias   (resident)
            ],
            out_specs=pl.BlockSpec((tile_b, n_pad), lambda i: (i, 0)),
        ),
        compiler_params=pltpu.CompilerParams(
            dimension_semantics=("parallel",),
            vmem_limit_bytes=_VMEM_LIMIT_BYTES,
        ),
    )(x, w, b2d)

    out = out[:, :num_classes]
    return out.reshape(*orig_shape[:-1], num_classes)


if __name__ == "__main__":
    # Small shapes consistent with the module: batch=2, d_model=32, 8 classes.
    batch = 2
    d_model = 32
    num_classes = 8

    key = jax.random.PRNGKey(0)
    k_x, k_w, k_b = jax.random.split(key, 3)

    hidden_states = jax.random.normal(k_x, (batch, d_model), dtype=jnp.float32)
    # Deterministic "init" of the nn.Linear parameters (PyTorch weight layout).
    weight = jax.random.normal(k_w, (num_classes, d_model), dtype=jnp.float32) * 0.02
    bias = jax.random.normal(k_b, (num_classes,), dtype=jnp.float32) * 0.01

    # Default path: bf16 activation/weight stream, f32 accumulate.
    out = mamba_classification_head(hidden_states, weight, bias)
    out = jax.block_until_ready(out)

    ref = hidden_states @ weight.T + bias
    assert out.shape == (batch, num_classes)
    assert out.dtype == hidden_states.dtype
    # bf16 stream + f32 accumulate -> ~1e-2-level error vs the f32 reference.
    assert jnp.allclose(out, ref, atol=2e-2, rtol=2e-2), "bf16 path mismatch vs reference"

    # Exact-numerics path (f32 stream) should match tightly.
    out_f32 = jax.block_until_ready(
        mamba_classification_head(hidden_states, weight, bias, compute_dtype=None))
    assert jnp.allclose(out_f32, ref, atol=1e-5, rtol=1e-5), "f32 path mismatch vs reference"

    print("KERNEL_OK")
</pallas_src>

<mosaic_0001>
module attributes {stable_mosaic.version = 11 : i64} {
  func.func @_linear_kernel(%arg0: i32, %arg1: memref<2x32xbf16, #tpu.memory_space<vmem>>, %arg2: memref<128x32xbf16, #tpu.memory_space<vmem>>, %arg3: memref<1x128xf32, #tpu.memory_space<vmem>>, %arg4: memref<2x128xf32, #tpu.memory_space<vmem>>) attributes {dimension_semantics = [#tpu.dimension_semantics<parallel>], iteration_bounds = array<i64: 1>, scalar_prefetch = 0 : i64, scratch_operands = 0 : i64, tpu.core_type = #tpu.core_type<tc>, window_params = [{transform_indices = @transform_0, window_bounds = array<i64: 2, 32>}, {pipeline_mode = #tpu.pipeline_mode<synchronous>, transform_indices = @transform_1, window_bounds = array<i64: 128, 32>}, {pipeline_mode = #tpu.pipeline_mode<synchronous>, transform_indices = @transform_2, window_bounds = array<i64: 1, 128>}, {transform_indices = @transform_3, window_bounds = array<i64: 2, 128>}]} {
    %c0 = arith.constant 0 : index
    %c0_0 = arith.constant 0 : index
    %0 = vector.load %arg1[%c0, %c0_0] : memref<2x32xbf16, #tpu.memory_space<vmem>>, vector<2x32xbf16>
    %c0_1 = arith.constant 0 : index
    %c0_2 = arith.constant 0 : index
    %1 = vector.load %arg2[%c0_1, %c0_2] : memref<128x32xbf16, #tpu.memory_space<vmem>>, vector<128x32xbf16>
    %cst = arith.constant dense<0.000000e+00> : vector<2x128xf32>
    %2 = tpu.matmul %0, %1, %cst {dimension_numbers = #tpu.dot_dimension_numbers<[1], [1], [0], [0], [0, 0, 1, 0], [], []>} : vector<2x32xbf16>, vector<128x32xbf16>, vector<2x128xf32> -> vector<2x128xf32>
    %c0_3 = arith.constant 0 : index
    %c0_4 = arith.constant 0 : index
    %3 = vector.load %arg3[%c0_3, %c0_4] : memref<1x128xf32, #tpu.memory_space<vmem>>, vector<1x128xf32>
    %4 = vector.broadcast %3 : vector<1x128xf32> to vector<2x128xf32>
    %5 = arith.addf %2, %4 : vector<2x128xf32>
    %c0_5 = arith.constant 0 : index
    %c0_6 = arith.constant 0 : index
    %6 = vector.load %arg4[%c0_5, %c0_6] : memref<2x128xf32, #tpu.memory_space<vmem>>, vector<2x128xf32>
    tpu.vector_store %arg4[%c0_5, %c0_6], %5 {strides = array<i32>} : memref<2x128xf32, #tpu.memory_space<vmem>>, vector<2x128xf32>,
    return
  }
  func.func @transform_0(%arg0: i32) -> (i32, i32) {
    %c0_i32 = arith.constant 0 : i32
    %c0_i32_0 = arith.constant 0 : i32
    return %arg0, %c0_i32 : i32, i32
  }
  func.func @transform_1(%arg0: i32) -> (i32, i32) {
    %c0_i32 = arith.constant 0 : i32
    %c0_i32_0 = arith.constant 0 : i32
    %c0_i32_1 = arith.constant 0 : i32
    return %c0_i32, %c0_i32_0 : i32, i32
  }
  func.func @transform_2(%arg0: i32) -> (i32, i32) {
    %c0_i32 = arith.constant 0 : i32
    %c0_i32_0 = arith.constant 0 : i32
    %c0_i32_1 = arith.constant 0 : i32
    return %c0_i32, %c0_i32_0 : i32, i32
  }
  func.func @transform_3(%arg0: i32) -> (i32, i32) {
    %c0_i32 = arith.constant 0 : i32
    %c0_i32_0 = arith.constant 0 : i32
    return %arg0, %c0_i32 : i32, i32
  }
}

</mosaic_0001>

<bundles_post_ra>
// kernel: tpu_custom_call.1
= control target key start
LH: loop header
LB: loop body
LE: loop exit
PB: predicated region body
PF: predicated region fallthrough
CT: control target
= control target key end

     0   :  { %v237_v1 = vmov 0.0   ;;  %vm80_vm0 = vcmask 261120   ;;  %vm238_vm1 = vmmov 0   ;;  %s311_s0 = inlined_call_operand.vmem [shape: bf16[2,32], index: 0, kind: input, shape index: {}]   ;;  %s312_s1 = inlined_call_operand.vmem [shape: bf16[128,32], index: 1, kind: input, shape index: {}]   ;;  %s313_s2 = inlined_call_operand.vmem [shape: f32[1,128], index: 2, kind: input, shape index: {}]   ;;  %s314_s3 = inlined_call_operand.hbm [shape: f32[2,128], index: 3, kind: output, shape index: {}]  }
   0x1   :  { %v205_v0 = vld [vmem:[%s312_s1] sm:$0xff]   ;;  %182 = vmatprep.subr.bf16.mxu0 %v237_v1  ;;  %v206_v3 = vld [vmem:[%s312_s1 + $0x8] sm:$0xff]   ;;  %198 = vmatprep.mubr.msk.bf16.mxu0 %vm238_vm1, %v237_v1 }
   0x2   :  { %v85_v2 = vsel %vm80_vm0, %v205_v0, 0  ;;  %v88_v4 = vsel %vm80_vm0, %v206_v3, 0 }
   0x3   :  { %183 = vmatpush3.bf16.xpose.msra.mxu0 %v85_v2 }
   0x4   :  { %184 = vmatprep.subr.bf16.mxu0 %v237_v1 }
   0x5   :  { %8 = vsyncpa [#allocation3], 0  ;;  %v207_v5 = vld [vmem:[%s312_s1 + $0x10] sm:$0xff]   ;;  %v208_v7 = vld [vmem:[%s312_s1 + $0x18] sm:$0xff]   ;;  %s239_s5 = smov [#allocation2]  }
   0x6   :  { %v91_v6 = vsel %vm80_vm0, %v207_v5, 0  ;;  %v94_v8 = vsel %vm80_vm0, %v208_v7, 0  ;;  %v209_v9 = vld [vmem:[%s312_s1 + $0x20] sm:$0xff]   ;;  %v210_v11 = vld [vmem:[%s312_s1 + $0x28] sm:$0xff]   ;;  %v211_v13 = vld [vmem:[%s312_s1 + $0x30] sm:$0xff]   ;;  %s155_s6 = sshll.u32 %s239_s5, 4  ;;  %s156_s6 = int_to_ptr.vmem [resolvable:$true] %s155_s6 }
   0x7   :  { %v97_v10 = vsel %vm80_vm0, %v209_v9, 0  ;;  %v100_v12 = vsel %vm80_vm0, %v210_v11, 0  ;;  %v103_v14 = vsel %vm80_vm0, %v211_v13, 0  ;;  %v212_v15 = vld [vmem:[%s312_s1 + $0x38] sm:$0xff]   ;;  %v16_v17 = vld [vmem:[%s311_s0] sm:$0x1]  ;;  %p218_p1 = scmp.lt.s32.totalorder %s156_s6, %s156_s6 }
   0x8   :  { %v106_v16 = vsel %vm80_vm0, %v212_v15, 0  ;;  %v163_v18 = vld [vmem:[%s313_s2] ss:$0 sm:$0xff]  ;;  %s213_s1 = scalar_lea.vmem %s156_s6, 32 }
   0x9   :  { %p214_p0 = scmp.ne.s32.totalorder %s156_s6, %s213_s1  ;;  %p219_p2 = scmp.lt.s32.totalorder %s213_s1, %s213_s1 }
   0xb   :  { %185 = vmatpush3.bf16.xpose.msra.mxu0 %v88_v4  ;;  %p220_p3 = por %p219_p2, %p218_p1 }
   0xc   :  { %186 = vmatprep.subr.bf16.mxu0 %v237_v1 }
   0xd   :  { %p221_p4 = pnand %p220_p3, %p214_p0 }
  0x13   :  { %187 = vmatpush3.bf16.xpose.msra.mxu0 %v91_v6 }
  0x14   :  { %188 = vmatprep.subr.bf16.mxu0 %v237_v1 }
  0x1b   :  { %189 = vmatpush3.bf16.xpose.msra.mxu0 %v94_v8 }
  0x1c   :  { %190 = vmatprep.subr.bf16.mxu0 %v237_v1 }
  0x23   :  { %191 = vmatpush3.bf16.xpose.msra.mxu0 %v97_v10 }
  0x24   :  { %192 = vmatprep.subr.bf16.mxu0 %v237_v1 }
  0x2b   :  { %193 = vmatpush3.bf16.xpose.msra.mxu0 %v100_v12 }
  0x2c   :  { %194 = vmatprep.subr.bf16.mxu0 %v237_v1 }
  0x33   :  { %195 = vmatpush3.bf16.xpose.msra.mxu0 %v103_v14 }
  0x34   :  { %196 = vmatprep.subr.bf16.mxu0 %v237_v1 }
  0x3b   :  { %197 = vmatpush3.bf16.xpose.msra.mxu0 %v106_v16 }
  0x42   :  { %199 = vmatmul.mubr.msk.bf16.vlgmr.msra.gmra.mrb[0].mxu0 %vm80_vm0, %v16_v17 }
 0x115   :  { %v142_v19 = vpop.f32.mrb[0].mxu0 }
 0x116   :  { %v143_v20 = vadd.f32 %v163_v18, %v142_v19  ;;  %v200_v21 = vpop.f32.mrb[1].mxu0 }
 0x117   :  { %v145_v22 = vpop.f32.mrb[2].mxu0 }
 0x118   :  { %148 = vst [vmem:[#allocation2] sm:$0x3] %v143_v20  ;;  %v201_v23 = vpop.f32.mrb[3].mxu0 }
 0x119   :  { %224 = shalt.err (!%p221_p4)
}
 0x11a   :  { %s225_s2 = scalar_lea.hbm %s314_s3, 32 }
 0x11b   :  { %p226_p5 = scmp.ne.s32.totalorder %s314_s3, %s225_s2  ;;  %p229_p6 = scmp.lt.u32.totalorder %s225_s2, %s314_s3 }
 0x11d   :  { %p231_p7 = pnand %p229_p6, %p226_p5 }
 0x11f   :  { %234 = shalt.err (!%p231_p7)
}
 0x120   :  { %158 = dma.vmem_to_hbm [thread:$0]  %s156_s6, 32, %s314_s3, [#allocation3]  }
 0x121   :  { %235 = dma.done.wait [#allocation3], 32  }
 0x122   :  { %236 = vsyncadd [#allocation3], 4294967264 }
 0x123   :  { %162 = vsyncpa [#allocation3], 1 }

</bundles_post_ra>
